<compile_context>
chip_gen: v5e
topology: v5e:2x2
jax: 0.10.0
libtpu: 0.0.40
codegen_flags: <defaults>
</compile_context>

<pallas_src>
import math
import functools

import jax
import jax.numpy as jnp
from jax.experimental import pallas as pl
from jax.experimental.pallas import tpu as pltpu


# ----------------------------------------------------------------------------
# PE table construction (deterministic buffer setup, plain JAX)
# ----------------------------------------------------------------------------
def make_pe_table(d_model: int, max_len: int, dtype=jnp.float32) -> jnp.ndarray:
    position = jnp.arange(0, max_len, dtype=jnp.float32)[:, None]            # (max_len, 1)
    div_term = jnp.exp(
        jnp.arange(0, d_model, 2, dtype=jnp.float32) * (-math.log(10000.0) / d_model)
    )                                                                         # (d_model//2,)
    pe = jnp.zeros((max_len, d_model), dtype=jnp.float32)
    pe = pe.at[:, 0::2].set(jnp.sin(position * div_term))
    pe = pe.at[:, 1::2].set(jnp.cos(position * div_term))
    # torch: pe.unsqueeze(0).transpose(0, 1) -> (max_len, 1, d_model)
    return pe[:, None, :].astype(dtype)


# ----------------------------------------------------------------------------
# Stateless hash RNG (murmur3 fmix32) -- portable, tile-size independent
# ----------------------------------------------------------------------------
_M1 = 0x85EBCA6B
_M2 = 0xC2B2AE35


def _fmix32_py(x: int) -> int:
    x &= 0xFFFFFFFF
    x ^= x >> 16
    x = (x * _M1) & 0xFFFFFFFF
    x ^= x >> 13
    x = (x * _M2) & 0xFFFFFFFF
    x ^= x >> 16
    return x


def _fmix32(x):
    # x: uint32 array
    x = x ^ (x >> jnp.uint32(16))
    x = x * jnp.uint32(_M1)
    x = x ^ (x >> jnp.uint32(13))
    x = x * jnp.uint32(_M2)
    x = x ^ (x >> jnp.uint32(16))
    return x


# ----------------------------------------------------------------------------
# Pallas kernels
# ----------------------------------------------------------------------------
def _pe_add_kernel(x_ref, pe_ref, o_ref, *, nb: int, d: int, per_slice: bool):
    # x_ref/o_ref: (ts, nb*d); pe_ref: (ts, d)
    pe = pe_ref[...]
    if nb == 1:
        o_ref[...] = x_ref[...] + pe
    elif per_slice:
        # Per-batch slice adds: only the D-wide PE stays live, each output
        # chunk is written once (no x-tile-sized broadcast temp).
        for b in range(nb):
            sl = slice(b * d, (b + 1) * d)
            o_ref[:, sl] = x_ref[:, sl] + pe
    else:
        # Fallback when D is not 128-aligned (slices would be lane-unaligned).
        o_ref[...] = x_ref[...] + jnp.tile(pe, (1, nb))


def _pe_add_dropout_kernel(x_ref, pe_ref, o_ref, *, nb: int, d: int,
                           n_cols_total: int, seed_hash: int,
                           threshold: int, inv_keep: float, per_slice: bool):
    # Training path: (x + pe) * bernoulli(keep_prob) / keep_prob,
    # mask derived from a hash of the global (row, col) element index.
    ts, w = o_ref.shape
    i = pl.program_id(0)
    j = pl.program_id(1)
    rows = i * ts + jax.lax.broadcasted_iota(jnp.int32, (ts, 1), 0)      # (ts, 1)
    base = rows * jnp.int32(n_cols_total) + j * jnp.int32(w)             # (ts, 1)
    pe = pe_ref[...]
    scale = jnp.asarray(inv_keep, x_ref.dtype)

    def drop(y, idx_i32):
        bits = _fmix32(idx_i32.astype(jnp.uint32) ^ jnp.uint32(seed_hash))
        bits31 = (bits & jnp.uint32(0x7FFFFFFF)).astype(jnp.int32)
        keep = bits31 < jnp.int32(threshold)                  # P(keep)=thr/2^31
        return jnp.where(keep, y * scale, jnp.zeros_like(y))

    if nb == 1 or not per_slice:
        y = x_ref[...] + (pe if nb == 1 else jnp.tile(pe, (1, nb)))
        cols = jax.lax.broadcasted_iota(jnp.int32, (ts, w), 1)
        o_ref[...] = drop(y, base + cols)
    else:
        cols = jax.lax.broadcasted_iota(jnp.int32, (ts, d), 1)
        for b in range(nb):
            sl = slice(b * d, (b + 1) * d)
            y = x_ref[:, sl] + pe
            o_ref[:, sl] = drop(y, base + jnp.int32(b * d) + cols)


# ----------------------------------------------------------------------------
# Wrapper
# ----------------------------------------------------------------------------
def _round_up(a: int, b: int) -> int:
    return (a + b - 1) // b * b


def _choose_tiles(S: int, B: int, D: int, itemsize: int,
                  target_tile_bytes: int = 8 << 20,
                  lane_target: int = 2048):
    """Pick (seq_tile, batches_per_lane_tile, per_slice_flag)."""
    per_slice = (D % 128 == 0)
    if per_slice and B > 1:
        # Group whole batches so the lane width is ~lane_target lanes; keeps
        # the per-slice unroll short and gives the pipeliner extra grid steps.
        bg = max(1, min(B, lane_target // D)) if D <= lane_target else 1
    else:
        bg = B  # can't split at a 128-aligned batch boundary -> full rows
    w = bg * D
    row_bytes = w * itemsize
    ts = max(8, (target_tile_bytes // max(row_bytes, 1)) // 8 * 8)
    ts = min(ts, _round_up(S, 8))
    return ts, bg, per_slice


def positional_encoding(
    x: jnp.ndarray,
    pe: jnp.ndarray,
    *,
    dropout_p: float = 0.1,
    training: bool = False,
    seed: int = 0,
    seq_tile: int | None = None,
) -> jnp.ndarray:
    """x: (S, B, D); pe: (max_len, 1, D). Returns dropout(x + pe[:S])."""
    S, B, D = x.shape
    assert S <= pe.shape[0], "sequence length exceeds PE table max_len"
    dtype = x.dtype
    itemsize = jnp.dtype(dtype).itemsize
    N = B * D

    # Lane-dense 2-D slabs: x -> (S, B*D); pe -> (S, D) in x's dtype so the
    # kernel never promotes the activation tile.
    x2 = x.reshape(S, N)
    pe2 = pe[:S, 0, :].astype(dtype)

    ts, bg, per_slice = _choose_tiles(S, B, D, itemsize)
    if seq_tile is not None:
        ts = max(8, min(int(seq_tile), _round_up(S, 8)))
    w = bg * D

    # No padding / trailing slice: boundary blocks are masked by Pallas.
    grid = (pl.cdiv(S, ts), pl.cdiv(B, bg))

    x_spec = pl.BlockSpec((ts, w), lambda i, j: (i, j))
    pe_spec = pl.BlockSpec((ts, D), lambda i, j: (i, 0))
    o_spec = pl.BlockSpec((ts, w), lambda i, j: (i, j))
    out_shape = jax.ShapeDtypeStruct((S, N), dtype)
    cparams = pltpu.CompilerParams(
        dimension_semantics=("parallel", "parallel"),
        vmem_limit_bytes=48 << 20,   # 8 MiB tiles double-buffered (x+out) ~ 32 MiB
    )

    if (not training) or dropout_p == 0.0:
        out2 = pl.pallas_call(
            functools.partial(_pe_add_kernel, nb=bg, d=D, per_slice=per_slice),
            out_shape=out_shape,
            grid=grid,
            in_specs=[x_spec, pe_spec],
            out_specs=o_spec,
            compiler_params=cparams,
        )(x2, pe2)
    else:
        keep_prob = 1.0 - float(dropout_p)
        threshold = max(1, min(int(round(keep_prob * 2147483648.0)), 2147483647))
        out2 = pl.pallas_call(
            functools.partial(
                _pe_add_dropout_kernel, nb=bg, d=D, n_cols_total=N,
                seed_hash=_fmix32_py(int(seed)), threshold=threshold,
                inv_keep=1.0 / keep_prob, per_slice=per_slice),
            out_shape=out_shape,
            grid=grid,
            in_specs=[x_spec, pe_spec],
            out_specs=o_spec,
            compiler_params=cparams,
        )(x2, pe2)

    return out2.reshape(S, B, D)


# ----------------------------------------------------------------------------
# Main
# ----------------------------------------------------------------------------
if __name__ == "__main__":
    # Lane-dense shape (D multiple of 128) -> per-batch-slice kernel path.
    d_model = 128
    max_len = 64
    seq = 16
    batch = 4
    dropout_p = 0.1

    key = jax.random.PRNGKey(0)
    x = jax.random.normal(key, (seq, batch, d_model), dtype=jnp.float32)
    pe = make_pe_table(d_model, max_len, dtype=x.dtype)

    # Eval-mode forward (dropout is identity) -- deterministic, checkable.
    out = positional_encoding(x, pe, dropout_p=dropout_p, training=False)
    out = jax.block_until_ready(out)
    ref = x + pe[:seq]
    assert out.shape == x.shape
    assert jnp.allclose(out, ref, atol=1e-6), "mismatch vs reference (eval path)"

    # Training-mode path (hash-based dropout): every element must be either 0
    # (dropped) or (x+pe)/keep_prob (kept), and most elements must be kept.
    keep_prob = 1.0 - dropout_p
    out_train = positional_encoding(x, pe, dropout_p=dropout_p, training=True, seed=42)
    out_train = jax.block_until_ready(out_train)
    ok = jnp.isclose(out_train, 0.0, atol=1e-6) | jnp.isclose(
        out_train, ref / keep_prob, atol=1e-5)
    assert bool(jnp.all(ok)), "dropout path produced unexpected values"
    kept_frac = float(jnp.mean(jnp.abs(out_train) > 1e-6))
    assert 0.5 < kept_frac <= 1.0, f"implausible keep fraction {kept_frac}"

    # Non-128-aligned D -> tile-broadcast fallback path.
    d2, b2, s2 = 32, 2, 8
    x_small = jax.random.normal(jax.random.PRNGKey(1), (s2, b2, d2), dtype=jnp.float32)
    pe_small = make_pe_table(d2, max_len, dtype=x_small.dtype)
    out_small = jax.block_until_ready(
        positional_encoding(x_small, pe_small, dropout_p=dropout_p, training=False))
    assert jnp.allclose(out_small, x_small + pe_small[:s2], atol=1e-6), \
        "mismatch vs reference (fallback path)"

    print("KERNEL_OK")
</pallas_src>

<mosaic_0001>
module attributes {stable_mosaic.version = 11 : i64} {
  func.func @_pe_add_kernel(%arg0: i32, %arg1: i32, %arg2: memref<16x512xf32, #tpu.memory_space<vmem>>, %arg3: memref<16x128xf32, #tpu.memory_space<vmem>>, %arg4: memref<16x512xf32, #tpu.memory_space<vmem>>) attributes {dimension_semantics = [#tpu.dimension_semantics<parallel>, #tpu.dimension_semantics<parallel>], iteration_bounds = array<i64: 1, 1>, scalar_prefetch = 0 : i64, scratch_operands = 0 : i64, tpu.core_type = #tpu.core_type<tc>, window_params = [{transform_indices = @transform_0, window_bounds = array<i64: 16, 512>}, {transform_indices = @transform_1, window_bounds = array<i64: 16, 128>}, {transform_indices = @transform_2, window_bounds = array<i64: 16, 512>}]} {
    %c0 = arith.constant 0 : index
    %c0_0 = arith.constant 0 : index
    %0 = vector.load %arg3[%c0, %c0_0] : memref<16x128xf32, #tpu.memory_space<vmem>>, vector<16x128xf32>
    %c0_1 = arith.constant 0 : index
    %c0_2 = arith.constant 0 : index
    %1 = vector.load %arg2[%c0_1, %c0_2] : memref<16x512xf32, #tpu.memory_space<vmem>>, vector<16x128xf32>
    %2 = arith.addf %1, %0 : vector<16x128xf32>
    %c0_3 = arith.constant 0 : index
    %c0_4 = arith.constant 0 : index
    %3 = vector.load %arg4[%c0_3, %c0_4] : memref<16x512xf32, #tpu.memory_space<vmem>>, vector<16x128xf32>
    tpu.vector_store %arg4[%c0_3, %c0_4], %2 {strides = array<i32>} : memref<16x512xf32, #tpu.memory_space<vmem>>, vector<16x128xf32>,
    %c0_5 = arith.constant 0 : index
    %c128 = arith.constant 128 : index
    %4 = vector.load %arg2[%c0_5, %c128] : memref<16x512xf32, #tpu.memory_space<vmem>>, vector<16x128xf32>
    %5 = arith.addf %4, %0 : vector<16x128xf32>
    %c0_6 = arith.constant 0 : index
    %c128_7 = arith.constant 128 : index
    %6 = vector.load %arg4[%c0_6, %c128_7] : memref<16x512xf32, #tpu.memory_space<vmem>>, vector<16x128xf32>
    tpu.vector_store %arg4[%c0_6, %c128_7], %5 {strides = array<i32>} : memref<16x512xf32, #tpu.memory_space<vmem>>, vector<16x128xf32>,
    %c0_8 = arith.constant 0 : index
    %c256 = arith.constant 256 : index
    %7 = vector.load %arg2[%c0_8, %c256] : memref<16x512xf32, #tpu.memory_space<vmem>>, vector<16x128xf32>
    %8 = arith.addf %7, %0 : vector<16x128xf32>
    %c0_9 = arith.constant 0 : index
    %c256_10 = arith.constant 256 : index
    %9 = vector.load %arg4[%c0_9, %c256_10] : memref<16x512xf32, #tpu.memory_space<vmem>>, vector<16x128xf32>
    tpu.vector_store %arg4[%c0_9, %c256_10], %8 {strides = array<i32>} : memref<16x512xf32, #tpu.memory_space<vmem>>, vector<16x128xf32>,
    %c0_11 = arith.constant 0 : index
    %c384 = arith.constant 384 : index
    %10 = vector.load %arg2[%c0_11, %c384] : memref<16x512xf32, #tpu.memory_space<vmem>>, vector<16x128xf32>
    %11 = arith.addf %10, %0 : vector<16x128xf32>
    %c0_12 = arith.constant 0 : index
    %c384_13 = arith.constant 384 : index
    %12 = vector.load %arg4[%c0_12, %c384_13] : memref<16x512xf32, #tpu.memory_space<vmem>>, vector<16x128xf32>
    tpu.vector_store %arg4[%c0_12, %c384_13], %11 {strides = array<i32>} : memref<16x512xf32, #tpu.memory_space<vmem>>, vector<16x128xf32>,
    return
  }
  func.func @transform_0(%arg0: i32, %arg1: i32) -> (i32, i32) {
    %c0_i32 = arith.constant 0 : i32
    return %arg0, %arg1 : i32, i32
  }
  func.func @transform_1(%arg0: i32, %arg1: i32) -> (i32, i32) {
    %c0_i32 = arith.constant 0 : i32
    %c0_i32_0 = arith.constant 0 : i32
    return %arg0, %c0_i32 : i32, i32
  }
  func.func @transform_2(%arg0: i32, %arg1: i32) -> (i32, i32) {
    %c0_i32 = arith.constant 0 : i32
    return %arg0, %arg1 : i32, i32
  }
}

</mosaic_0001>

<bundles_post_ra>
// kernel: tpu_custom_call.1
= control target key start
LH: loop header
LB: loop body
LE: loop exit
PB: predicated region body
PF: predicated region fallthrough
CT: control target
= control target key end

     0   :  { %7 = vsyncpa [#allocation3], 0  ;;  %s212_s0 = inlined_call_operand.hbm [shape: f32[16,512], index: 0, kind: input, shape index: {}]   ;;  %s213_s1 = inlined_call_operand.hbm [shape: f32[16,128], index: 1, kind: input, shape index: {}]   ;;  %s214_s2 = inlined_call_operand.hbm [shape: f32[16,512], index: 2, kind: output, shape index: {}]  }
   0x1   :  { %8 = vsyncpa [#allocation6], 0 }
   0x2   :  { %9 = vsyncpa [#allocation4], 0  ;;  %s14_s11 = sshll.u32 %s212_s0, 4  ;;  %s175_s12 = smov [#allocation2]   ;;  %s15_s11 = int_to_ptr.hbm [resolvable:$true] %s14_s11 }
   0x3   :  { %s16_s13 = sshll.u32 %s175_s12, 4  ;;  %s27_s16 = sshll.u32 %s213_s1, 4  ;;  %s17_s13 = int_to_ptr.vmem [resolvable:$true] %s16_s13  ;;  %s28_s16 = int_to_ptr.hbm [resolvable:$true] %s27_s16 }
   0x4   :  { %s176_s17 = smov 512   ;;  %s177_s18 = smov 32  }
   0x5   :  { %22 = dma.hbm_to_vmem [thread:$0]  %s15_s11, 1024, %s17_s13, [#allocation3], %s176_s17, %s176_s17, %s177_s18  }
   0x6   :  { %s178_s19 = smov [#allocation5]   ;;  %s179_s21 = smov 128  }
   0x7   :  { %s29_s20 = sshll.u32 %s178_s19, 4  ;;  %s180_s0 = smov 8   ;;  %s30_s20 = int_to_ptr.vmem [resolvable:$true] %s29_s20 }
   0x8   :  { %35 = dma.hbm_to_vmem [thread:$0]  %s28_s16, 256, %s30_s20, [#allocation6], %s179_s21, %s179_s21, %s180_s0  }
   0x9   :  { %169 = dma.done.wait [#allocation3], 1024  }
   0xa   :  { %170 = vsyncadd [#allocation3], 4294966272 }
   0xb   :  { %171 = dma.done.wait [#allocation6], 256  }
   0xc   :  { %172 = vsyncadd [#allocation6], 4294967040  ;;  %v44_v0 = vld [vmem:[#allocation5] sm:$0xff]  ;;  %v45_v2 = vld [vmem:[#allocation5 + $0x8] sm:$0xff]  ;;  %s181_s1 = smov [#allocation7]   ;;  %s76_s25 = sshll.u32 %s214_s2, 4  ;;  %s77_s25 = int_to_ptr.hbm [resolvable:$true] %s76_s25 }
   0xd   :  { %v46_v1 = vld [vmem:[#allocation2] sm:$0xff]  ;;  %v52_v5 = vld [vmem:[#allocation2 + $0x8] sm:$0xff]  ;;  %v58_v10 = vld [vmem:[#allocation2 + $0x10] sm:$0xff]  ;;  %s74_s22 = sshll.u32 %s181_s1, 4  ;;  %s75_s22 = int_to_ptr.vmem [resolvable:$true] %s74_s22 }
   0xe   :  { %v48_v3 = vadd.f32 %v46_v1, %v44_v0  ;;  %v47_v4 = vld [vmem:[#allocation2 + $0x20] sm:$0xff]  ;;  %v53_v6 = vld [vmem:[#allocation2 + $0x28] sm:$0xff]  ;;  %v54_v8 = vadd.f32 %v52_v5, %v44_v0  ;;  %v59_v11 = vld [vmem:[#allocation2 + $0x30] sm:$0xff]  ;;  %v60_v13 = vadd.f32 %v58_v10, %v44_v0 }
   0xf   :  { %v49_v7 = vadd.f32 %v47_v4, %v45_v2  ;;  %v55_v9 = vadd.f32 %v53_v6, %v45_v2  ;;  %v64_v12 = vld [vmem:[#allocation2 + $0x18] sm:$0xff]  ;;  %v61_v15 = vadd.f32 %v59_v11, %v45_v2 }
  0x10   :  { %50 = vst [vmem:[#allocation7] sm:$0xff] %v48_v3  ;;  %v65_v14 = vld [vmem:[#allocation2 + $0x38] sm:$0xff]  ;;  %v66_v16 = vadd.f32 %v64_v12, %v44_v0 }
  0x11   :  { %51 = vst [vmem:[#allocation7 + $0x20] sm:$0xff] %v49_v7  ;;  %v67_v17 = vadd.f32 %v65_v14, %v45_v2 }
  0x12   :  { %56 = vst [vmem:[#allocation7 + $0x8] sm:$0xff] %v54_v8 }
  0x13   :  { %57 = vst [vmem:[#allocation7 + $0x28] sm:$0xff] %v55_v9 }
  0x14   :  { %62 = vst [vmem:[#allocation7 + $0x10] sm:$0xff] %v60_v13 }
  0x15   :  { %63 = vst [vmem:[#allocation7 + $0x30] sm:$0xff] %v61_v15 }
  0x16   :  { %68 = vst [vmem:[#allocation7 + $0x18] sm:$0xff] %v66_v16 }
  0x17   :  { %69 = vst [vmem:[#allocation7 + $0x38] sm:$0xff] %v67_v17 }
  0x18   :  { %82 = dma.vmem_to_hbm [thread:$0]  %s75_s22, 1024, %s77_s25, [#allocation4], %s176_s17, %s176_s17, %s177_s18  }
  0x19   :  { %173 = dma.done.wait [#allocation4], 1024  }
  0x1a   :  { %174 = vsyncadd [#allocation4], 4294966272 }
  0x1b   :  { %87 = vsyncpa [#allocation3], 1 }
  0x1c   :  { %88 = vsyncpa [#allocation6], 1 }
  0x1d   :  { %89 = vsyncpa [#allocation4], 1 }

</bundles_post_ra>
